<compile_context>
chip_gen: v7x
topology: tpu7x:2x2x1
jax: 0.10.0
libtpu: 0.0.40
codegen_flags: <defaults>
</compile_context>

<pallas_src>
import functools

import jax
import jax.numpy as jnp
from jax.experimental import pallas as pl
from jax.experimental.pallas import tpu as pltpu


def _bottleneck_kernel(x_ref, w1_ref, b1_ref, w2_ref, b2_ref, mask_ref, o_ref,
                       *, H, W, shortcut):
    """Fused Bottleneck forward for ONE image in (channels, H*W) layout.

    x_ref   : (1, Cin, HW)       input image (flattened NCHW slice)
    w1_ref  : (Ce_pad, Cin)      1x1 conv weight, BN1 scale folded, zero-padded rows
    b1_ref  : (Ce_pad, 1)        folded BN1 bias (padded rows -> 0)
    w2_ref  : (9, Cout, Ce_pad)  3x3 conv weight per tap, BN2 scale folded
    b2_ref  : (Cout, 1)          folded BN2 bias
    mask_ref: (9, 1, HW)         per-tap validity mask (1.0 in-bounds, 0.0 else)
    o_ref   : (1, Cout, HW)      output image
    """
    HW = H * W
    Cout = o_ref.shape[1]

    x = x_ref[0]                                               # (Cin, HW)

    # ---- conv1 (1x1, BN scale folded) + bias + ReLU: one MXU matmul --------
    h = jnp.dot(w1_ref[...], x, preferred_element_type=jnp.float32)
    h = jnp.maximum(h + b1_ref[...], 0.0)                      # (Ce_pad, HW)

    # ---- conv2 (3x3, pad=1): stream 9 taps into accumulating matmuls -------
    # Output lane l = y*W + x needs input lane l + s with s = dh*W + dw;
    # a roll by -s provides it, and the precomputed mask zeroes every
    # out-of-bounds (wrap-around) position.  Rolls ride the XLU slot.
    acc = jnp.zeros((Cout, HW), jnp.float32)
    for k in range(9):
        kh, kw = divmod(k, 3)
        dh, dw = kh - 1, kw - 1
        s = dh * W + dw
        tap = h if s == 0 else pltpu.roll(h, (-s) % HW, 1)     # (Ce_pad, HW)
        if not (dh == 0 and dw == 0):
            tap = tap * mask_ref[k]                            # (1, HW) bcast
        acc = acc + jnp.dot(w2_ref[k], tap,
                            preferred_element_type=jnp.float32)

    y = jnp.maximum(acc + b2_ref[...], 0.0)                    # (Cout, HW)

    if shortcut:
        y = y + x                                              # Cin == Cout

    o_ref[0] = y.astype(o_ref.dtype)


def _fold_bn(gamma, beta, mean, var, eps=1e-5):
    scale = gamma / jnp.sqrt(var + eps)
    return scale, beta - mean * scale


def _round_up(x, m):
    return (x + m - 1) // m * m


def bottleneck_forward(x_nchw, w1_pt, bn1, w2_pt, bn2, *, shortcut=True,
                       eps=1e-5):
    """Bottleneck forward.  Takes PyTorch-layout tensors.

    x_nchw : (N, Cin, H, W)
    w1_pt  : (Ce, Cin, 1, 1)   conv1 weight (OIHW)
    w2_pt  : (Cout, Ce, 3, 3)  conv2 weight (OIHW)
    bn1/bn2: (gamma, beta, running_mean, running_var)
    Returns (N, Cout, H, W).
    """
    N, Cin, H, W = x_nchw.shape
    Ce = w1_pt.shape[0]
    Cout = w2_pt.shape[0]
    HW = H * W
    use_shortcut = shortcut and (Cin == Cout)

    Ce_pad = _round_up(Ce, 8)   # f32 sublane multiple; padded rows stay zero.

    # ---- conv1 weight: fold BN1 scale, transpose to (Ce_pad, Cin) ----------
    s1, bias1 = _fold_bn(*bn1, eps=eps)
    w1s = w1_pt.reshape(Ce, Cin) * s1[:, None]
    w1s = jnp.pad(w1s, ((0, Ce_pad - Ce), (0, 0)))                  # (Ce_pad, Cin)
    b1 = jnp.pad(bias1, (0, Ce_pad - Ce)).reshape(Ce_pad, 1)

    # ---- conv2 weight: fold BN2 scale, tap-major (9, Cout, Ce_pad) ---------
    s2, bias2 = _fold_bn(*bn2, eps=eps)
    w2s = w2_pt * s2[:, None, None, None]                           # (Cout,Ce,3,3)
    w2_tap = jnp.transpose(w2s, (2, 3, 0, 1)).reshape(9, Cout, Ce)  # (9,Cout,Ce)
    w2_tap = jnp.pad(w2_tap, ((0, 0), (0, 0), (0, Ce_pad - Ce)))
    b2 = bias2.reshape(Cout, 1)

    # ---- per-tap boundary masks (precomputed once, f32 0/1) ----------------
    yy, xx = jnp.meshgrid(jnp.arange(H), jnp.arange(W), indexing="ij")
    masks = []
    for kh in range(3):
        for kw in range(3):
            dh, dw = kh - 1, kw - 1
            valid = ((yy + dh >= 0) & (yy + dh < H) &
                     (xx + dw >= 0) & (xx + dw < W))
            masks.append(valid.reshape(1, HW).astype(jnp.float32))
    mask = jnp.stack(masks, axis=0)                                 # (9, 1, HW)

    x_flat = x_nchw.reshape(N, Cin, HW)      # free reshape, stays NCHW order

    kernel = functools.partial(_bottleneck_kernel, H=H, W=W,
                               shortcut=use_shortcut)

    flops = 2 * N * HW * (Ce_pad * Cin + 9 * Cout * Ce_pad) \
        + 4 * N * HW * (Ce_pad + Cout)
    bytes_accessed = 4 * (x_flat.size + N * Cout * HW + w1s.size + b1.size
                          + w2_tap.size + b2.size + mask.size)

    out = pl.pallas_call(
        kernel,
        out_shape=jax.ShapeDtypeStruct((N, Cout, HW), x_nchw.dtype),
        grid=(N,),                           # one image per step, both TCs busy
        in_specs=[
            pl.BlockSpec((1, Cin, HW), lambda n: (n, 0, 0)),
            pl.BlockSpec((Ce_pad, Cin), lambda n: (0, 0)),
            pl.BlockSpec((Ce_pad, 1), lambda n: (0, 0)),
            pl.BlockSpec((9, Cout, Ce_pad), lambda n: (0, 0, 0)),
            pl.BlockSpec((Cout, 1), lambda n: (0, 0)),
            pl.BlockSpec((9, 1, HW), lambda n: (0, 0, 0)),
        ],
        out_specs=pl.BlockSpec((1, Cout, HW), lambda n: (n, 0, 0)),
        compiler_params=pltpu.CompilerParams(
            dimension_semantics=("parallel",)),
        cost_estimate=pl.CostEstimate(flops=int(flops), transcendentals=0,
                                      bytes_accessed=int(bytes_accessed)),
    )(x_flat, w1s, b1, w2_tap, b2, mask)

    return out.reshape(N, Cout, H, W)        # free: already NCHW order


def bottleneck_reference(x_nchw, w1_pt, bn1, w2_pt, bn2, *, shortcut=True,
                         eps=1e-5):
    """Pure-JAX reference (XLA convs, same math)."""
    def bn(x, params):
        g, b, m, v = (p.reshape(1, -1, 1, 1) for p in params)
        return (x - m) / jnp.sqrt(v + eps) * g + b

    h = jax.lax.conv_general_dilated(
        x_nchw, w1_pt, (1, 1), 'VALID',
        dimension_numbers=('NCHW', 'OIHW', 'NCHW'))
    h = jax.nn.relu(bn(h, bn1))
    y = jax.lax.conv_general_dilated(
        h, w2_pt, (1, 1), 'SAME',
        dimension_numbers=('NCHW', 'OIHW', 'NCHW'))
    y = jax.nn.relu(bn(y, bn2))
    if shortcut and x_nchw.shape[1] == w2_pt.shape[0]:
        y = y + x_nchw
    return y


if __name__ == "__main__":
    # Bottleneck(in_channels=4, out_channels=4, shortcut=True, groups=1,
    #            expansion=0.5, activation='ReLU')
    N, Cin, H, W = 2, 4, 16, 16
    Cout = 4
    expansion = 0.5
    Ce = int(Cout * expansion)               # = 2

    key = jax.random.PRNGKey(0)
    keys = jax.random.split(key, 11)

    x = jax.random.normal(keys[0], (N, Cin, H, W), jnp.float32)

    w1 = 0.2 * jax.random.normal(keys[1], (Ce, Cin, 1, 1), jnp.float32)
    bn1 = (1.0 + 0.1 * jax.random.normal(keys[2], (Ce,), jnp.float32),
           0.1 * jax.random.normal(keys[3], (Ce,), jnp.float32),
           0.1 * jax.random.normal(keys[4], (Ce,), jnp.float32),
           1.0 + 0.1 * jnp.abs(jax.random.normal(keys[5], (Ce,), jnp.float32)))

    w2 = 0.2 * jax.random.normal(keys[6], (Cout, Ce, 3, 3), jnp.float32)
    bn2 = (1.0 + 0.1 * jax.random.normal(keys[7], (Cout,), jnp.float32),
           0.1 * jax.random.normal(keys[8], (Cout,), jnp.float32),
           0.1 * jax.random.normal(keys[9], (Cout,), jnp.float32),
           1.0 + 0.1 * jnp.abs(jax.random.normal(keys[10], (Cout,), jnp.float32)))

    out = bottleneck_forward(x, w1, bn1, w2, bn2, shortcut=True)
    out = jax.block_until_ready(out)

    ref = bottleneck_reference(x, w1, bn1, w2, bn2, shortcut=True)
    ref = jax.block_until_ready(ref)

    assert out.shape == (N, Cout, H, W)
    err = float(jnp.max(jnp.abs(out - ref)))
    assert err < 2e-4, f"mismatch vs reference: max abs err = {err}"

    print("KERNEL_OK")
</pallas_src>

<mosaic_0001>
module attributes {stable_mosaic.version = 11 : i64} {
  func.func @_bottleneck_kernel(%arg0: i32, %arg1: memref<1x4x256xf32, #tpu.memory_space<vmem>>, %arg2: memref<8x4xf32, #tpu.memory_space<vmem>>, %arg3: memref<8x1xf32, #tpu.memory_space<vmem>>, %arg4: memref<9x4x8xf32, #tpu.memory_space<vmem>>, %arg5: memref<4x1xf32, #tpu.memory_space<vmem>>, %arg6: memref<9x1x256xf32, #tpu.memory_space<vmem>>, %arg7: memref<1x4x256xf32, #tpu.memory_space<vmem>>) attributes {dimension_semantics = [#tpu.dimension_semantics<parallel>], iteration_bounds = array<i64: 2>, scalar_prefetch = 0 : i64, scratch_operands = 0 : i64, tpu.core_type = #tpu.core_type<tc>, window_params = [{transform_indices = @transform_0, window_bounds = array<i64: 1, 4, 256>}, {pipeline_mode = #tpu.pipeline_mode<synchronous>, transform_indices = @transform_1, window_bounds = array<i64: 8, 4>}, {pipeline_mode = #tpu.pipeline_mode<synchronous>, transform_indices = @transform_2, window_bounds = array<i64: 8, 1>}, {pipeline_mode = #tpu.pipeline_mode<synchronous>, transform_indices = @transform_3, window_bounds = array<i64: 9, 4, 8>}, {pipeline_mode = #tpu.pipeline_mode<synchronous>, transform_indices = @transform_4, window_bounds = array<i64: 4, 1>}, {pipeline_mode = #tpu.pipeline_mode<synchronous>, transform_indices = @transform_5, window_bounds = array<i64: 9, 1, 256>}, {transform_indices = @transform_6, window_bounds = array<i64: 1, 4, 256>}]} {
    %c0 = arith.constant 0 : index
    %c0_0 = arith.constant 0 : index
    %c0_1 = arith.constant 0 : index
    %0 = vector.load %arg1[%c0, %c0_0, %c0_1] : memref<1x4x256xf32, #tpu.memory_space<vmem>>, vector<1x4x256xf32>
    %1 = vector.shape_cast %0 : vector<1x4x256xf32> to vector<4x256xf32>
    %c0_2 = arith.constant 0 : index
    %c0_3 = arith.constant 0 : index
    %2 = vector.load %arg2[%c0_2, %c0_3] : memref<8x4xf32, #tpu.memory_space<vmem>>, vector<8x4xf32>
    %cst = arith.constant dense<0.000000e+00> : vector<8x256xf32>
    %3 = tpu.matmul %2, %1, %cst {dimension_numbers = #tpu.dot_dimension_numbers<[1], [0], [0], [1], [0, 0, 1, 1], [], []>} : vector<8x4xf32>, vector<4x256xf32>, vector<8x256xf32> -> vector<8x256xf32>
    %c0_4 = arith.constant 0 : index
    %c0_5 = arith.constant 0 : index
    %4 = vector.load %arg3[%c0_4, %c0_5] : memref<8x1xf32, #tpu.memory_space<vmem>>, vector<8x1xf32>
    %5 = vector.broadcast %4 : vector<8x1xf32> to vector<8x256xf32>
    %6 = arith.addf %3, %5 : vector<8x256xf32>
    %cst_6 = arith.constant 0.000000e+00 : f32
    %7 = vector.broadcast %cst_6 : f32 to vector<8x256xf32>
    %8 = arith.maximumf %6, %7 : vector<8x256xf32>
    %cst_7 = arith.constant 0.000000e+00 : f32
    %9 = vector.broadcast %cst_7 : f32 to vector<4x256xf32>
    %c17_i32 = arith.constant 17 : i32
    %10 = tpu.dynamic_rotate %8 by %c17_i32 dim 1 : vector<8x256xf32>, i32 -> vector<8x256xf32>
    %c0_8 = arith.constant 0 : index
    %c0_9 = arith.constant 0 : index
    %c0_10 = arith.constant 0 : index
    %11 = vector.load %arg6[%c0_8, %c0_9, %c0_10] : memref<9x1x256xf32, #tpu.memory_space<vmem>>, vector<1x1x256xf32>
    %12 = vector.shape_cast %11 : vector<1x1x256xf32> to vector<1x256xf32>
    %13 = vector.broadcast %12 : vector<1x256xf32> to vector<8x256xf32>
    %14 = arith.mulf %10, %13 : vector<8x256xf32>
    %c0_11 = arith.constant 0 : index
    %c0_12 = arith.constant 0 : index
    %c0_13 = arith.constant 0 : index
    %15 = vector.load %arg4[%c0_11, %c0_12, %c0_13] : memref<9x4x8xf32, #tpu.memory_space<vmem>>, vector<1x4x8xf32>
    %16 = vector.shape_cast %15 : vector<1x4x8xf32> to vector<4x8xf32>
    %cst_14 = arith.constant dense<0.000000e+00> : vector<4x256xf32>
    %17 = tpu.matmul %16, %14, %cst_14 {dimension_numbers = #tpu.dot_dimension_numbers<[1], [0], [0], [1], [0, 0, 1, 1], [], []>} : vector<4x8xf32>, vector<8x256xf32>, vector<4x256xf32> -> vector<4x256xf32>
    %18 = arith.addf %9, %17 : vector<4x256xf32>
    %c16_i32 = arith.constant 16 : i32
    %19 = tpu.dynamic_rotate %8 by %c16_i32 dim 1 : vector<8x256xf32>, i32 -> vector<8x256xf32>
    %c1 = arith.constant 1 : index
    %c0_15 = arith.constant 0 : index
    %c0_16 = arith.constant 0 : index
    %20 = vector.load %arg6[%c1, %c0_15, %c0_16] : memref<9x1x256xf32, #tpu.memory_space<vmem>>, vector<1x1x256xf32>
    %21 = vector.shape_cast %20 : vector<1x1x256xf32> to vector<1x256xf32>
    %22 = vector.broadcast %21 : vector<1x256xf32> to vector<8x256xf32>
    %23 = arith.mulf %19, %22 : vector<8x256xf32>
    %c1_17 = arith.constant 1 : index
    %c0_18 = arith.constant 0 : index
    %c0_19 = arith.constant 0 : index
    %24 = vector.load %arg4[%c1_17, %c0_18, %c0_19] : memref<9x4x8xf32, #tpu.memory_space<vmem>>, vector<1x4x8xf32>
    %25 = vector.shape_cast %24 : vector<1x4x8xf32> to vector<4x8xf32>
    %cst_20 = arith.constant dense<0.000000e+00> : vector<4x256xf32>
    %26 = tpu.matmul %25, %23, %cst_20 {dimension_numbers = #tpu.dot_dimension_numbers<[1], [0], [0], [1], [0, 0, 1, 1], [], []>} : vector<4x8xf32>, vector<8x256xf32>, vector<4x256xf32> -> vector<4x256xf32>
    %27 = arith.addf %18, %26 : vector<4x256xf32>
    %c15_i32 = arith.constant 15 : i32
    %28 = tpu.dynamic_rotate %8 by %c15_i32 dim 1 : vector<8x256xf32>, i32 -> vector<8x256xf32>
    %c2 = arith.constant 2 : index
    %c0_21 = arith.constant 0 : index
    %c0_22 = arith.constant 0 : index
    %29 = vector.load %arg6[%c2, %c0_21, %c0_22] : memref<9x1x256xf32, #tpu.memory_space<vmem>>, vector<1x1x256xf32>
    %30 = vector.shape_cast %29 : vector<1x1x256xf32> to vector<1x256xf32>
    %31 = vector.broadcast %30 : vector<1x256xf32> to vector<8x256xf32>
    %32 = arith.mulf %28, %31 : vector<8x256xf32>
    %c2_23 = arith.constant 2 : index
    %c0_24 = arith.constant 0 : index
    %c0_25 = arith.constant 0 : index
    %33 = vector.load %arg4[%c2_23, %c0_24, %c0_25] : memref<9x4x8xf32, #tpu.memory_space<vmem>>, vector<1x4x8xf32>
    %34 = vector.shape_cast %33 : vector<1x4x8xf32> to vector<4x8xf32>
    %cst_26 = arith.constant dense<0.000000e+00> : vector<4x256xf32>
    %35 = tpu.matmul %34, %32, %cst_26 {dimension_numbers = #tpu.dot_dimension_numbers<[1], [0], [0], [1], [0, 0, 1, 1], [], []>} : vector<4x8xf32>, vector<8x256xf32>, vector<4x256xf32> -> vector<4x256xf32>
    %36 = arith.addf %27, %35 : vector<4x256xf32>
    %c1_i32 = arith.constant 1 : i32
    %37 = tpu.dynamic_rotate %8 by %c1_i32 dim 1 : vector<8x256xf32>, i32 -> vector<8x256xf32>
    %c3 = arith.constant 3 : index
    %c0_27 = arith.constant 0 : index
    %c0_28 = arith.constant 0 : index
    %38 = vector.load %arg6[%c3, %c0_27, %c0_28] : memref<9x1x256xf32, #tpu.memory_space<vmem>>, vector<1x1x256xf32>
    %39 = vector.shape_cast %38 : vector<1x1x256xf32> to vector<1x256xf32>
    %40 = vector.broadcast %39 : vector<1x256xf32> to vector<8x256xf32>
    %41 = arith.mulf %37, %40 : vector<8x256xf32>
    %c3_29 = arith.constant 3 : index
    %c0_30 = arith.constant 0 : index
    %c0_31 = arith.constant 0 : index
    %42 = vector.load %arg4[%c3_29, %c0_30, %c0_31] : memref<9x4x8xf32, #tpu.memory_space<vmem>>, vector<1x4x8xf32>
    %43 = vector.shape_cast %42 : vector<1x4x8xf32> to vector<4x8xf32>
    %cst_32 = arith.constant dense<0.000000e+00> : vector<4x256xf32>
    %44 = tpu.matmul %43, %41, %cst_32 {dimension_numbers = #tpu.dot_dimension_numbers<[1], [0], [0], [1], [0, 0, 1, 1], [], []>} : vector<4x8xf32>, vector<8x256xf32>, vector<4x256xf32> -> vector<4x256xf32>
    %45 = arith.addf %36, %44 : vector<4x256xf32>
    %c4 = arith.constant 4 : index
    %c0_33 = arith.constant 0 : index
    %c0_34 = arith.constant 0 : index
    %46 = vector.load %arg4[%c4, %c0_33, %c0_34] : memref<9x4x8xf32, #tpu.memory_space<vmem>>, vector<1x4x8xf32>
    %47 = vector.shape_cast %46 : vector<1x4x8xf32> to vector<4x8xf32>
    %cst_35 = arith.constant dense<0.000000e+00> : vector<4x256xf32>
    %48 = tpu.matmul %47, %8, %cst_35 {dimension_numbers = #tpu.dot_dimension_numbers<[1], [0], [0], [1], [0, 0, 1, 1], [], []>} : vector<4x8xf32>, vector<8x256xf32>, vector<4x256xf32> -> vector<4x256xf32>
    %49 = arith.addf %45, %48 : vector<4x256xf32>
    %c255_i32 = arith.constant 255 : i32
    %50 = tpu.dynamic_rotate %8 by %c255_i32 dim 1 : vector<8x256xf32>, i32 -> vector<8x256xf32>
    %c5 = arith.constant 5 : index
    %c0_36 = arith.constant 0 : index
    %c0_37 = arith.constant 0 : index
    %51 = vector.load %arg6[%c5, %c0_36, %c0_37] : memref<9x1x256xf32, #tpu.memory_space<vmem>>, vector<1x1x256xf32>
    %52 = vector.shape_cast %51 : vector<1x1x256xf32> to vector<1x256xf32>
    %53 = vector.broadcast %52 : vector<1x256xf32> to vector<8x256xf32>
    %54 = arith.mulf %50, %53 : vector<8x256xf32>
    %c5_38 = arith.constant 5 : index
    %c0_39 = arith.constant 0 : index
    %c0_40 = arith.constant 0 : index
    %55 = vector.load %arg4[%c5_38, %c0_39, %c0_40] : memref<9x4x8xf32, #tpu.memory_space<vmem>>, vector<1x4x8xf32>
    %56 = vector.shape_cast %55 : vector<1x4x8xf32> to vector<4x8xf32>
    %cst_41 = arith.constant dense<0.000000e+00> : vector<4x256xf32>
    %57 = tpu.matmul %56, %54, %cst_41 {dimension_numbers = #tpu.dot_dimension_numbers<[1], [0], [0], [1], [0, 0, 1, 1], [], []>} : vector<4x8xf32>, vector<8x256xf32>, vector<4x256xf32> -> vector<4x256xf32>
    %58 = arith.addf %49, %57 : vector<4x256xf32>
    %c241_i32 = arith.constant 241 : i32
    %59 = tpu.dynamic_rotate %8 by %c241_i32 dim 1 : vector<8x256xf32>, i32 -> vector<8x256xf32>
    %c6 = arith.constant 6 : index
    %c0_42 = arith.constant 0 : index
    %c0_43 = arith.constant 0 : index
    %60 = vector.load %arg6[%c6, %c0_42, %c0_43] : memref<9x1x256xf32, #tpu.memory_space<vmem>>, vector<1x1x256xf32>
    %61 = vector.shape_cast %60 : vector<1x1x256xf32> to vector<1x256xf32>
    %62 = vector.broadcast %61 : vector<1x256xf32> to vector<8x256xf32>
    %63 = arith.mulf %59, %62 : vector<8x256xf32>
    %c6_44 = arith.constant 6 : index
    %c0_45 = arith.constant 0 : index
    %c0_46 = arith.constant 0 : index
    %64 = vector.load %arg4[%c6_44, %c0_45, %c0_46] : memref<9x4x8xf32, #tpu.memory_space<vmem>>, vector<1x4x8xf32>
    %65 = vector.shape_cast %64 : vector<1x4x8xf32> to vector<4x8xf32>
    %cst_47 = arith.constant dense<0.000000e+00> : vector<4x256xf32>
    %66 = tpu.matmul %65, %63, %cst_47 {dimension_numbers = #tpu.dot_dimension_numbers<[1], [0], [0], [1], [0, 0, 1, 1], [], []>} : vector<4x8xf32>, vector<8x256xf32>, vector<4x256xf32> -> vector<4x256xf32>
    %67 = arith.addf %58, %66 : vector<4x256xf32>
    %c240_i32 = arith.constant 240 : i32
    %68 = tpu.dynamic_rotate %8 by %c240_i32 dim 1 : vector<8x256xf32>, i32 -> vector<8x256xf32>
    %c7 = arith.constant 7 : index
    %c0_48 = arith.constant 0 : index
    %c0_49 = arith.constant 0 : index
    %69 = vector.load %arg6[%c7, %c0_48, %c0_49] : memref<9x1x256xf32, #tpu.memory_space<vmem>>, vector<1x1x256xf32>
    %70 = vector.shape_cast %69 : vector<1x1x256xf32> to vector<1x256xf32>
    %71 = vector.broadcast %70 : vector<1x256xf32> to vector<8x256xf32>
    %72 = arith.mulf %68, %71 : vector<8x256xf32>
    %c7_50 = arith.constant 7 : index
    %c0_51 = arith.constant 0 : index
    %c0_52 = arith.constant 0 : index
    %73 = vector.load %arg4[%c7_50, %c0_51, %c0_52] : memref<9x4x8xf32, #tpu.memory_space<vmem>>, vector<1x4x8xf32>
    %74 = vector.shape_cast %73 : vector<1x4x8xf32> to vector<4x8xf32>
    %cst_53 = arith.constant dense<0.000000e+00> : vector<4x256xf32>
    %75 = tpu.matmul %74, %72, %cst_53 {dimension_numbers = #tpu.dot_dimension_numbers<[1], [0], [0], [1], [0, 0, 1, 1], [], []>} : vector<4x8xf32>, vector<8x256xf32>, vector<4x256xf32> -> vector<4x256xf32>
    %76 = arith.addf %67, %75 : vector<4x256xf32>
    %c239_i32 = arith.constant 239 : i32
    %77 = tpu.dynamic_rotate %8 by %c239_i32 dim 1 : vector<8x256xf32>, i32 -> vector<8x256xf32>
    %c8 = arith.constant 8 : index
    %c0_54 = arith.constant 0 : index
    %c0_55 = arith.constant 0 : index
    %78 = vector.load %arg6[%c8, %c0_54, %c0_55] : memref<9x1x256xf32, #tpu.memory_space<vmem>>, vector<1x1x256xf32>
    %79 = vector.shape_cast %78 : vector<1x1x256xf32> to vector<1x256xf32>
    %80 = vector.broadcast %79 : vector<1x256xf32> to vector<8x256xf32>
    %81 = arith.mulf %77, %80 : vector<8x256xf32>
    %c8_56 = arith.constant 8 : index
    %c0_57 = arith.constant 0 : index
    %c0_58 = arith.constant 0 : index
    %82 = vector.load %arg4[%c8_56, %c0_57, %c0_58] : memref<9x4x8xf32, #tpu.memory_space<vmem>>, vector<1x4x8xf32>
    %83 = vector.shape_cast %82 : vector<1x4x8xf32> to vector<4x8xf32>
    %cst_59 = arith.constant dense<0.000000e+00> : vector<4x256xf32>
    %84 = tpu.matmul %83, %81, %cst_59 {dimension_numbers = #tpu.dot_dimension_numbers<[1], [0], [0], [1], [0, 0, 1, 1], [], []>} : vector<4x8xf32>, vector<8x256xf32>, vector<4x256xf32> -> vector<4x256xf32>
    %85 = arith.addf %76, %84 : vector<4x256xf32>
    %c0_60 = arith.constant 0 : index
    %c0_61 = arith.constant 0 : index
    %86 = vector.load %arg5[%c0_60, %c0_61] : memref<4x1xf32, #tpu.memory_space<vmem>>, vector<4x1xf32>
    %87 = vector.broadcast %86 : vector<4x1xf32> to vector<4x256xf32>
    %88 = arith.addf %85, %87 : vector<4x256xf32>
    %cst_62 = arith.constant 0.000000e+00 : f32
    %89 = vector.broadcast %cst_62 : f32 to vector<4x256xf32>
    %90 = arith.maximumf %88, %89 : vector<4x256xf32>
    %91 = arith.addf %90, %1 : vector<4x256xf32>
    %c0_63 = arith.constant 0 : index
    %c0_64 = arith.constant 0 : index
    %c0_65 = arith.constant 0 : index
    %92 = vector.load %arg7[%c0_63, %c0_64, %c0_65] : memref<1x4x256xf32, #tpu.memory_space<vmem>>, vector<1x4x256xf32>
    %93 = vector.shape_cast %92 : vector<1x4x256xf32> to vector<4x256xf32>
    %94 = vector.shape_cast %91 : vector<4x256xf32> to vector<1x4x256xf32>
    tpu.vector_store %arg7[%c0_63, %c0_64, %c0_65], %94 {strides = array<i32>} : memref<1x4x256xf32, #tpu.memory_space<vmem>>, vector<1x4x256xf32>,
    return
  }
  func.func @transform_0(%arg0: i32) -> (i32, i32, i32) {
    %c0_i32 = arith.constant 0 : i32
    %c0_i32_0 = arith.constant 0 : i32
    %c0_i32_1 = arith.constant 0 : i32
    return %arg0, %c0_i32, %c0_i32_0 : i32, i32, i32
  }
  func.func @transform_1(%arg0: i32) -> (i32, i32) {
    %c0_i32 = arith.constant 0 : i32
    %c0_i32_0 = arith.constant 0 : i32
    %c0_i32_1 = arith.constant 0 : i32
    return %c0_i32, %c0_i32_0 : i32, i32
  }
  func.func @transform_2(%arg0: i32) -> (i32, i32) {
    %c0_i32 = arith.constant 0 : i32
    %c0_i32_0 = arith.constant 0 : i32
    %c0_i32_1 = arith.constant 0 : i32
    return %c0_i32, %c0_i32_0 : i32, i32
  }
  func.func @transform_3(%arg0: i32) -> (i32, i32, i32) {
    %c0_i32 = arith.constant 0 : i32
    %c0_i32_0 = arith.constant 0 : i32
    %c0_i32_1 = arith.constant 0 : i32
    %c0_i32_2 = arith.constant 0 : i32
    return %c0_i32, %c0_i32_0, %c0_i32_1 : i32, i32, i32
  }
  func.func @transform_4(%arg0: i32) -> (i32, i32) {
    %c0_i32 = arith.constant 0 : i32
    %c0_i32_0 = arith.constant 0 : i32
    %c0_i32_1 = arith.constant 0 : i32
    return %c0_i32, %c0_i32_0 : i32, i32
  }
  func.func @transform_5(%arg0: i32) -> (i32, i32, i32) {
    %c0_i32 = arith.constant 0 : i32
    %c0_i32_0 = arith.constant 0 : i32
    %c0_i32_1 = arith.constant 0 : i32
    %c0_i32_2 = arith.constant 0 : i32
    return %c0_i32, %c0_i32_0, %c0_i32_1 : i32, i32, i32
  }
  func.func @transform_6(%arg0: i32) -> (i32, i32, i32) {
    %c0_i32 = arith.constant 0 : i32
    %c0_i32_0 = arith.constant 0 : i32
    %c0_i32_1 = arith.constant 0 : i32
    return %arg0, %c0_i32, %c0_i32_0 : i32, i32, i32
  }
}

</mosaic_0001>

<bundles_post_ra>
// kernel: tpu_custom_call.1
= control target key start
LH: loop header
LB: loop body
LE: loop exit
PB: predicated region body
PF: predicated region fallthrough
CT: control target
= control target key end

     0   :  { %11 = vsyncpa [#allocation3], 0  ;;  %s1751_s0 = inlined_call_operand.vmem [shape: f32[2,4,256], index: 0, kind: input, shape index: {}]   ;;  %s1752_s1 = inlined_call_operand.vmem [shape: f32[8,4], index: 1, kind: input, shape index: {}]   ;;  %s1753_s2 = inlined_call_operand.vmem [shape: f32[8,1], index: 2, kind: input, shape index: {}]   ;;  %s1754_s3 = inlined_call_operand.vmem [shape: f32[9,4,8], index: 3, kind: input, shape index: {}]   ;;  %s1755_s4 = inlined_call_operand.vmem [shape: f32[4,1], index: 4, kind: input, shape index: {}]   ;;  %s1756_s5 = inlined_call_operand.vmem [shape: f32[9,1,256], index: 5, kind: input, shape index: {}]   ;;  %s1757_s6 = inlined_call_operand.hbm [shape: f32[2,4,256], index: 6, kind: output, shape index: {}]  }
   0x1   :  { %13 = vsyncpa [#allocation3 + $0x1], 0  ;;  %s1528_s21 = smov 0   ;;  %s1530_s22 = smov 0  }
   0x2   :  { %s1532_s23 = smov 0   ;;  %s1534_s24 = smov 0  }
   0x3 LB: > { %s1549_s25 = sadd.s32 4294967295, %s1480_s24   ;;  %s1309_s26 = sadd.s32 4294967294, %s1480_s24   ;;  %s1480_s24 = sphi %s1534_s24, %s1763_s24   ;;  %s1476_s23 = sphi %s1532_s23, %s1762_s23   ;;  %s1472_s22 = sphi %s1530_s22, %s1761_s22   ;;  %s1468_s21 = sphi %s1528_s21, %s1760_s21  }
   0x4   : > { %s1553_s27 = sadd.s32 1, %s1480_s24   ;;  %s157_s28 = sadd.s32 1, %s1476_s23 }
   0x5   : > { %s154_s29 = ssub.s32 %s1480_s24, %s1553_s27  ;;  %p167_p0 = scmp.ne.s32.totalorder %s1476_s23, %s1472_s22 }
   0x6   : > { %p155_p1 = scmp.eq.s32.totalorder %s154_s29, 0  ;;  %p168_p2 = scmp.eq.s32.totalorder %s1549_s25, 1 }
   0x7   : > { %p173_p3 = scmp.ne.s32.totalorder %s1472_s22, %s1468_s21  ;;  %p174_p4 = scmp.eq.s32.totalorder %s1309_s26, 1 }
   0x8   : > { %s1564_s30 = scalar_select %p155_p1, %s1476_s23, %s157_s28  }
   0x9   : > { %p1566_p5 = por %p168_p2, %p167_p0  ;;  %p1570_p6 = por %p174_p4, %p173_p3 }
   0xa   : > { %p1312_p7 = scmp.ge.s32.totalorder %s1480_s24, 1  ;;  %p215_p8 = scmp.lt.s32.totalorder %s1480_s24, 3 }
   0xc   : > { %p216_p9 = pnand %p1312_p7, %p215_p8 }
   0xd   : > { %p245_p10 = scmp.lt.s32.totalorder (!%p216_p9), %s1549_s25, 1  ;;  %v1482_v0 = vmov (!%p216_p9), 0.0   ;;  %v1483_v1 = vmov (!%p216_p9), 0   ;;  %v252_v2 = vld [vmem:[%s1753_s2] sm:$0xff] (!%p216_p9)  ;;  %vm264_vm0 = vcmask (!%p216_p9), 1043456   ;;  %vm260_vm1 = vcmask (!%p216_p9), 31744  }
   0xe   : > { %219 = sbr.rel (%p216_p9) target bundleno = 631 (0x277), region = 44  ;;  %333 = vmatprep.mubr.f32.mxu0 (!%p216_p9), %v1482_v0  ;;  %1415 = vset.pattern.permute.xlu0 (!%p216_p9), %v1483_v1  ;;  %v251_v5 = vld [vmem:[%s1752_s1] sm:$0xff] (!%p216_p9)  ;;  %s1484_s18 = smov (!%p216_p9), 127   ;;  %vm390_vm2 = vcmask (!%p216_p9), 64512   ;;  %v1329_v13 = vld [vmem:[%s1754_s3 + $0x10] sm:$0xf] (!%p216_p9)  ;;  %v346_v15 = vlaneseq (!%p216_p9) }
   0xf   : > { %255 = vperm.xlu0 (!%p216_p9), %1415, %v252_v2   ;;  %808 = vmatprep.mubr.f32.mxu1 (!%p216_p9), %v1482_v0  ;;  %s1485_s19 = smov (!%p216_p9), 16   ;;  %s1486_s28 = smov (!%p216_p9), 17   ;;  %v1217_v14 = vld [vmem:[%s1755_s4] sm:$0xf] (!%p216_p9)  ;;  %v1331_v21 = vld [vmem:[%s1756_s5 + $0xa] sm:$0x3] (!%p216_p9) }
  0x10   : > { %1416 = vset.pattern.permute.xlu1 (!%p216_p9), %v1483_v1  ;;  %s1487_s29 = smov (!%p216_p9), 113   ;;  %s1488_s9 = smov (!%p216_p9), 15   ;;  %v354_v16 = vshrl.u32 (!%p216_p9), %v346_v15, 7  ;;  %v1606_v17 = vand.u32 (!%p216_p9), 127, %v346_v15  ;;  %v1319_v20 = vld [vmem:[%s1756_s5 + $0x2] sm:$0x3] (!%p216_p9) }
  0x11   : > { %s1489_s10 = smov (!%p216_p9), 112   ;;  %v351_v25 = vld [vmem:[%s1756_s5] sm:$0x3] (!%p216_p9)  ;;  %v1334_v41 = vld [vmem:[%s1756_s5 + $0xc] sm:$0x3] (!%p216_p9)  ;;  %s242_s17 = sand.u32 (!%p216_p9), 1, %s1472_s22  }
  0x12   : > { %v1608_v18 = vsub.s32 (!%p216_p9), 0, %v354_v16  ;;  %v1610_v19 = vsub.s32 (!%p216_p9), 1, %v354_v16  ;;  %vm370_vm3 = vcmp.lt.s32.totalorder (!%p216_p9), %v1606_v17, 16  ;;  %vm821_vm4 = vcmp.lt.s32.totalorder (!%p216_p9), %v1606_v17, 127  ;;  %v1320_v42 = vld [vmem:[%s1754_s3 + $0x4] sm:$0xf] (!%p216_p9) }
  0x13   : > { %vm348_vm5 = vcmp.lt.s32.totalorder (!%p216_p9), %v1606_v17, 17  ;;  %v1332_v43 = vld [vmem:[%s1754_s3 + $0x14] sm:$0xf] (!%p216_p9)  ;;  %vm921_vm6 = vcmp.lt.s32.totalorder (!%p216_p9), %v1606_v17, 113  ;;  %v1323_v52 = vld [vmem:[%s1756_s5 + $0x4] sm:$0x3] (!%p216_p9) }
  0x14   : > { %v379_v24 = vrot.slane (!%p216_p9), %v1319_v20, %v1608_v18  ;;  %v383_v26 = vrot.slane (!%p216_p9), %v1319_v20, %v1610_v19  ;;  %v830_v27 = vrot.slane (!%p216_p9), %v1331_v21, %v1608_v18  ;;  %v834_v28 = vrot.slane (!%p216_p9), %v1331_v21, %v1610_v19  ;;  %v1337_v61 = vld [vmem:[%s1756_s5 + $0xe] sm:$0x3] (!%p216_p9)  ;;  %v365_v62 = vld [vmem:[%s1754_s3] sm:$0xf] (!%p216_p9)  ;;  %v1335_v63 = vld [vmem:[%s1754_s3 + $0x18] sm:$0xf] (!%p216_p9) }
  0x15   : > { %s246_s11 = scalar_select %p245_p10, %s1549_s25, 1  ;;  %v356_v31 = vrot.slane %v351_v25, %v1608_v18  ;;  %v360_v32 = vrot.slane %v351_v25, %v1610_v19  ;;  %v930_v48 = vrot.slane %v1334_v41, %v1608_v18  ;;  %v934_v51 = vrot.slane %v1334_v41, %v1610_v19  ;;  %v1338_v25 = vld [vmem:[%s1754_s3 + $0x1c] sm:$0xf] }
  0x16   : > { %vm543_vm7 = vcmp.lt.s32.totalorder %v1606_v17, 15  ;;  %v552_v59 = vrot.slane %v1323_v52, %v1608_v18  ;;  %v556_v60 = vrot.slane %v1323_v52, %v1610_v19  ;;  %vm1021_vm8 = vcmp.lt.s32.totalorder %v1606_v17, 112 }
  0x17   : > { %s1348_s12 = sshll.u32 %s246_s11, 3  ;;  %s1490_s11 = smov 1   ;;  %vm643_vm9 = vcmp.lt.s32.totalorder %v1606_v17, 1  ;;  %vm1121_vm10 = vcmp.lt.s32.totalorder %v1606_v17, 111  ;;  %v1341_v17 = vld [vmem:[%s1754_s3 + $0x20] sm:$0xf] }
  0x18   : > { %s249_s15 = scalar_lea.vmem %s1751_s0, %s1348_s12  ;;  %s1491_s12 = smov 111  }
  0x19   : > { %v1586_v3 = vld [vmem:[%s249_s15] sm:$0xff] }
  0x1a   : > { %v1590_v4 = vcombine.high %v1586_v3, %v1586_v3 }
  0x1c   : > { %1316 = vmatprep.subr.msk.mxu0 %vm264_vm0, %v1590_v4 }
  0x1d   : > { %1317 = vmatpush1.msk.msra.mxu0 %vm264_vm0, %v1586_v3 }
  0x1e   : > { %1318 = vmatmul.mubr.msk.f32.vlgmr.msra.gmra.mrb[0].mxu0 %vm260_vm1, %v251_v5 }
  0x1f   : > { %458 = vmatprep.mubr.f32.mxu0 %v1482_v0 }
  0x8e   : > { %v256_v6 = vpop.permute.xlu0 %255 }
  0xf1   : > { %v335_v7 = vpop.f32.mrb[0].mxu0 }
  0xf2   : > { %v336_v8 = vadd.f32 %v335_v7, %v256_v6  ;;  %v337_v9 = vpop.f32.mrb[1].mxu0  ;;  %v1030_v7 = vrot.slane %v1337_v61, %v1608_v18 }
  0xf3   : > { %v338_v10 = vadd.f32 %v337_v9, %v256_v6 }
  0xf4   : > { %v340_v11 = vmax.f32 %v336_v8, 0.0 }
  0xf5   : > { %v341_v12 = vmax.f32 %v338_v10, 0.0  ;;  %v1034_v10 = vrot.slane %v1337_v61, %v1610_v19 }
  0xf6   : > { %817 = vrot.lane.b32.xlu1 %v340_v11, %s1484_s18  ;;  %366 = vrot.lane.b32.xlu0 %v340_v11, %s1485_s19 }
  0xf7   : > { %744 = vmatprep.subr.mxu1 %v341_v12 }
  0xf8   : > { %745 = vmatpush1.msra.mxu1 %v340_v11 }
  0xf9   : > { %1330 = vmatmul.mubr.msk.f32.vlgmr.msra.gmra.mrb[0].mxu1 %vm390_vm2, %v1329_v13 }
  0xfa   : > { %368 = vrot.lane.b32.xlu1 %v341_v12, %s1485_s19  ;;  %819 = vrot.lane.b32.xlu0 %v341_v12, %s1484_s18  ;;  %s1313_s18 = sshll.u32 %s242_s17, 3  ;;  %s1349_s19 = sshll.u32 %s1549_s25, 7 }
  0xfb   : > { %908 = vmatprep.mubr.f32.mxu1 %v1482_v0  ;;  %s244_s20 = scalar_lea.vmem [#allocation2], %s1313_s18  ;;  %s1492_s25 = smov [#allocation2]  }
  0xfc   : > { %s1250_s26 = sshll.u32 %s244_s20, 4  ;;  %s1711_s26 = int_to_ptr.vmem [resolvable:$true] %s1250_s26 }
  0xfe   : > { %342 = vrot.lane.b32.xlu1 %v340_v11, %s1486_s28  ;;  %344 = vrot.lane.b32.xlu0 %v341_v12, %s1486_s28 }
 0x102   : > { %917 = vrot.lane.b32.xlu1 %v340_v11, %s1487_s29  ;;  %919 = vrot.lane.b32.xlu0 %v341_v12, %s1487_s29 }
 0x106   : > { %539 = vrot.lane.b32.xlu1 %v340_v11, %s1488_s9  ;;  %541 = vrot.lane.b32.xlu0 %v341_v12, %s1488_s9  ;;  %s1709_s9 = scalar_lea.hbm %s1757_s6, %s1349_s19 }
 0x10a   : > { %1017 = vrot.lane.b32.xlu1 %v340_v11, %s1489_s10  ;;  %1019 = vrot.lane.b32.xlu0 %v341_v12, %s1489_s10  ;;  %s1236_s10 = scalar_lea.sflag [#allocation3], %s242_s17 }
 0x10e   : > { %639 = vrot.lane.b32.xlu1 %v340_v11, %s1490_s11  ;;  %641 = vrot.lane.b32.xlu0 %v341_v12, %s1490_s11  ;;  %s1418_s11 = scalar_lea.vmem %s1711_s26, 128 }
 0x10f   : > { %p1419_p11 = scmp.ne.s32.totalorder %s1711_s26, %s1418_s11 }
 0x111   : > { %p1420_p12 = pnand %p1419_p11, %p1566_p5 }
 0x112   : > { %1117 = vrot.lane.b32.xlu1 %v340_v11, %s1491_s12  ;;  %1119 = vrot.lane.b32.xlu0 %v341_v12, %s1491_s12  ;;  %v1326_v11 = vld [vmem:[%s1756_s5 + $0x6] sm:$0x3]  ;;  %s1422_s12 = sshll.u32 %s1492_s25, 4  ;;  %s1423_s12 = int_to_ptr.vmem [resolvable:$false] %s1422_s12 }
 0x113   : > { %v652_v21 = vrot.slane %v1326_v11, %v1608_v18  ;;  %p1421_p13 = pneg %p1420_p12  ;;  %s1424_s13 = scalar_lea.vmem %s1423_s12, 256 }
 0x114   : > { %p1425_p0 = scmp.lt.s32.totalorder %s1711_s26, %s1423_s12  ;;  %p1426_p1 = scmp.lt.s32.totalorder %s1424_s13, %s1418_s11 }
 0x116   : > { %1220 = vperm.xlu1 %1416, %v1217_v14   ;;  %p1427_p2 = por %p1426_p1, %p1425_p0 }
 0x118   : > { %p1428_p3 = pnand %p1427_p2, %p1421_p13 }
 0x168   : > { %v818_v22 = vpop.permute.xlu1 %817  ;;  %v367_v23 = vpop.permute.xlu0 %366 }
 0x16c   : > { %v369_v29 = vpop.permute.xlu1 %368  ;;  %v820_v30 = vpop.permute.xlu0 %819 }
 0x16d   : > { %v371_v33 = vsel %vm370_vm3, %v367_v23, %v369_v29  ;;  %v372_v34 = vsel %vm370_vm3, %v369_v29, %v367_v23  ;;  %v822_v35 = vsel %vm821_vm4, %v818_v22, %v820_v30  ;;  %v823_v36 = vsel %vm821_vm4, %v820_v30, %v818_v22  ;;  %v1340_v23 = vld [vmem:[%s1756_s5 + $0x10] sm:$0x3] }
 0x16e   : > { %v386_v37 = vmul.f32 %v379_v24, %v372_v34  ;;  %v387_v38 = vmul.f32 %v383_v26, %v371_v33  ;;  %v837_v39 = vmul.f32 %v830_v27, %v822_v35  ;;  %v838_v40 = vmul.f32 %v834_v28, %v823_v36  ;;  %v1324_v24 = vld [vmem:[%s1754_s3 + $0x8] sm:$0xf] }
 0x16f   : > { %v656_v22 = vrot.slane %v1326_v11, %v1610_v19  ;;  %v1130_v30 = vrot.slane %v1340_v23, %v1608_v18  ;;  %v1134_v33 = vrot.slane %v1340_v23, %v1610_v19 }
 0x170   : > { %v343_v44 = vpop.permute.xlu1 %342  ;;  %394 = vmatprep.subr.mxu0 %v387_v38  ;;  %v345_v45 = vpop.permute.xlu0 %344  ;;  %844 = vmatprep.subr.mxu1 %v838_v40 }
 0x171   : > { %v349_v46 = vsel %vm348_vm5, %v343_v44, %v345_v45  ;;  %v350_v47 = vsel %vm348_vm5, %v345_v45, %v343_v44  ;;  %395 = vmatpush1.msra.mxu0 %v386_v37  ;;  %845 = vmatpush1.msra.mxu1 %v837_v39  ;;  %v1327_v39 = vld [vmem:[%s1754_s3 + $0xc] sm:$0xf] }
 0x172   : > { %v363_v49 = vmul.f32 %v356_v31, %v350_v47  ;;  %v364_v50 = vmul.f32 %v360_v32, %v349_v46  ;;  %1321 = vmatmul.mubr.msk.f32.vlgmr.msra.gmra.mrb[2].mxu0 %vm390_vm2, %v1320_v42  ;;  %1333 = vmatmul.mubr.msk.f32.vlgmr.msra.gmra.mrb[0].mxu1 %vm390_vm2, %v1332_v43 }
 0x173   : > { %532 = vmatprep.mubr.f32.mxu0 %v1482_v0  ;;  %1008 = vmatprep.mubr.f32.mxu1 %v1482_v0 }
 0x174   : > { %v918_v53 = vpop.permute.xlu1 %917  ;;  %468 = vmatprep.subr.mxu0 %v364_v50  ;;  %v920_v54 = vpop.permute.xlu0 %919 }
 0x175   : > { %v922_v55 = vsel %vm921_vm6, %v918_v53, %v920_v54  ;;  %v923_v56 = vsel %vm921_vm6, %v920_v54, %v918_v53  ;;  %469 = vmatpush1.msra.mxu0 %v363_v49 }
 0x176   : > { %v937_v57 = vmul.f32 %v930_v48, %v922_v55  ;;  %v938_v58 = vmul.f32 %v934_v51, %v923_v56 }
 0x178   : > { %v540_v1 = vpop.permute.xlu1 %539  ;;  %v542_v2 = vpop.permute.xlu0 %541  ;;  %944 = vmatprep.subr.mxu1 %v938_v58 }
 0x179   : > { %v544_v5 = vsel %vm543_vm7, %v540_v1, %v542_v2  ;;  %v545_v6 = vsel %vm543_vm7, %v542_v2, %v540_v1  ;;  %945 = vmatpush1.msra.mxu1 %v937_v57 }
 0x17a   : > { %v559_v8 = vmul.f32 %v552_v59, %v545_v6  ;;  %v560_v9 = vmul.f32 %v556_v60, %v544_v5  ;;  %1322 = vmatmul.mubr.msk.f32.vlgmr.msra.gmra.mrb[2].mxu0 %vm390_vm2, %v365_v62  ;;  %1336 = vmatmul.mubr.msk.f32.vlgmr.msra.gmra.mrb[0].mxu1 %vm390_vm2, %v1335_v63 }
 0x17b   : > { %630 = vmatprep.mubr.f32.mxu0 %v1482_v0  ;;  %1108 = vmatprep.mubr.f32.mxu1 %v1482_v0 }
 0x17c   : > { %v1018_v12 = vpop.permute.xlu1 %1017  ;;  %566 = vmatprep.subr.mxu0 %v560_v9  ;;  %v1020_v13 = vpop.permute.xlu0 %1019 }
 0x17d   : > { %v1022_v14 = vsel %vm1021_vm8, %v1018_v12, %v1020_v13  ;;  %v1023_v15 = vsel %vm1021_vm8, %v1020_v13, %v1018_v12  ;;  %567 = vmatpush1.msra.mxu0 %v559_v8 }
 0x17e   : > { %v1037_v16 = vmul.f32 %v1030_v7, %v1022_v14  ;;  %v1038_v20 = vmul.f32 %v1034_v10, %v1023_v15 }
 0x180   : > { %v640_v26 = vpop.permute.xlu1 %639  ;;  %v642_v27 = vpop.permute.xlu0 %641  ;;  %1044 = vmatprep.subr.mxu1 %v1038_v20 }
 0x181   : > { %v644_v28 = vsel %vm643_vm9, %v640_v26, %v642_v27  ;;  %v645_v29 = vsel %vm643_vm9, %v642_v27, %v640_v26  ;;  %1045 = vmatpush1.msra.mxu1 %v1037_v16 }
 0x182   : > { %v659_v31 = vmul.f32 %v652_v21, %v645_v29  ;;  %v660_v32 = vmul.f32 %v656_v22, %v644_v28  ;;  %1325 = vmatmul.mubr.msk.f32.vlgmr.msra.gmra.mrb[2].mxu0 %vm390_vm2, %v1324_v24  ;;  %1339 = vmatmul.mubr.msk.f32.vlgmr.msra.gmra.mrb[0].mxu1 %vm390_vm2, %v1338_v25 }
 0x183   : > { %730 = vmatprep.mubr.f32.mxu0 %v1482_v0  ;;  %1208 = vmatprep.mubr.f32.mxu1 %v1482_v0 }
 0x184   : > { %v1118_v34 = vpop.permute.xlu1 %1117  ;;  %666 = vmatprep.subr.mxu0 %v660_v32  ;;  %v1120_v35 = vpop.permute.xlu0 %1119 }
 0x185   : > { %v1122_v36 = vsel %vm1121_vm10, %v1118_v34, %v1120_v35  ;;  %v1123_v18 = vsel %vm1121_vm10, %v1120_v35, %v1118_v34  ;;  %667 = vmatpush1.msra.mxu0 %v659_v31 }
 0x186   : > { %v1137_v37 = vmul.f32 %v1130_v30, %v1122_v36  ;;  %v1138_v38 = vmul.f32 %v1134_v33, %v1123_v18 }
 0x188   : > { %1144 = vmatprep.subr.mxu1 %v1138_v38 }
 0x189   : > { %1145 = vmatpush1.msra.mxu1 %v1137_v37 }
 0x18a   : > { %1328 = vmatmul.mubr.msk.f32.vlgmr.msra.gmra.mrb[2].mxu0 %vm390_vm2, %v1327_v39  ;;  %1342 = vmatmul.mubr.msk.f32.vlgmr.msra.gmra.mrb[0].mxu1 %vm390_vm2, %v1341_v17 }
 0x195   : > { %v1221_v0 = vpop.permute.xlu1 %1220 }
 0x25d   : > { %v732_v19 = vpop.f32.mrb[2].mxu0  ;;  %v1210_v40 = vpop.f32.mrb[0].mxu1 }
 0x25e   : > { %v1350_v41 = vadd.f32 %v1210_v40, %v732_v19  ;;  %v734_v42 = vpop.f32.mrb[3].mxu0  ;;  %v1212_v43 = vpop.f32.mrb[1].mxu1 }
 0x25f   : > { %v1351_v44 = vadd.f32 %v1212_v43, %v734_v42 }
 0x260   : > { %v1223_v45 = vadd.f32 %v1350_v41, %v1221_v0 }
 0x261   : > { %v1224_v46 = vadd.f32 %v1351_v44, %v1221_v0 }
 0x262   : > { %v1225_v47 = vmax.f32 %v1223_v45, 0.0 }
 0x263   : > { %v1226_v48 = vmax.f32 %v1224_v46, 0.0 }
 0x264   : > { %v1228_v49 = vadd.f32 %v1225_v47, %v1586_v3 }
 0x265   : > { %v1229_v50 = vadd.f32 %v1226_v48, %v1590_v4 }
 0x267   : > { %v1232_v51 = vcombine.low %v1228_v49, %v1229_v50 }
 0x269   : > { %1234 = vst [vmem:[%s244_s20] sm:$0xff] %v1232_v51 }
 0x26a   : > { %1431 = shalt.err (!%p1428_p3)
}
 0x26b   : > { %s1432_s14 = scalar_lea.hbm %s1709_s9, 128  ;;  %s1436_s17 = scalar_lea.hbm %s1757_s6, 256 }
 0x26c   : > { %p1433_p4 = scmp.ne.s32.totalorder %s1709_s9, %s1432_s14  ;;  %p1437_p9 = scmp.lt.u32.totalorder %s1709_s9, %s1757_s6 }
 0x26d   : > { %p1438_p10 = scmp.lt.u32.totalorder %s1436_s17, %s1432_s14  ;;  %p1440_p12 = scmp.lt.u32.totalorder %s1432_s14, %s1709_s9 }
 0x26e   : > { %p1434_p7 = pnand %p1433_p4, %p1566_p5 }
 0x26f   : > { %p1439_p11 = por %p1438_p10, %p1437_p9 }
 0x270   : > { %p1435_p8 = pneg %p1434_p7 }
 0x271   : > { %p1441_p13 = por %p1440_p12, %p1439_p11 }
 0x273   : > { %p1442_p0 = pnand %p1441_p13, %p1435_p8 }
 0x275   : > { %1445 = shalt.err (!%p1442_p0)
}
 0x276   : > { %1366 = dma.vmem_to_hbm [thread:$0]  (%p1566_p5), %s1711_s26, 128, %s1709_s9, %s1236_s10  }
 0x277 PF: > { %p1372_p1 = scmp.ge.s32.totalorder %s1480_s24, 2  ;;  %s1262_s20 = sand.u32 1, %s1468_s21  }
 0x278   : > { %s1263_s28 = scalar_lea.sflag [#allocation3], %s1262_s20 }
 0x279   : > { %p1369_p2 = pnand %p1372_p1, %p1570_p6 }
 0x27b   : > { %1463 = dma.done.wait (!%p1369_p2), %s1263_s28, 128  }
 0x27c   : > { %1465 = vsyncadd (!%p1369_p2), %s1263_s28, 4294967168  ;;  %p16_p3 = scmp.ge.s32.totalorder %s1553_s27, 4   ;;  %s1760_s21 = smov %s1472_s22 }
 0x27d   : > { %s1761_s22 = smov %s1476_s23  ;;  %s1762_s23 = smov %s1564_s30 }
 0x27e   : > { %s1763_s24 = smov %s1553_s27  ;;  %18 = sbr.rel (!%p16_p3) target bundleno = 3 (0x3), region = 94 }
 0x285   :  { %1268 = vsyncpa [#allocation3], 1 }
 0x286   :  { %1270 = vsyncpa [#allocation3 + $0x1], 1 }

</bundles_post_ra>
